<compile_context>
chip_gen: v5e
topology: v5e:2x2
jax: 0.10.0
libtpu: 0.0.40
codegen_flags: <defaults>
</compile_context>

<pallas_src>
import functools

import jax
import jax.numpy as jnp
from jax import lax
from jax.experimental import pallas as pl
from jax.experimental.pallas import tpu as pltpu

_LANE = 128      # TPU lane width: pad the class dim to this for unmasked stores.
_SUBLANE = 8     # TPU sublane width: batch tiles rounded to this.


def _linear_probe_kernel(x_ref, w_ref, b_ref, o_ref):
    """One batch tile of y = x @ W.T + b.

    x_ref: (TB, D)       activation tile
    w_ref: (C_pad, D)    padded weight, PyTorch [out, in] layout (no transpose!)
    b_ref: (1, C_pad)    padded bias
    o_ref: (TB, C_pad)   lane-dense output tile
    """
    # Contract on D directly against the untransposed weight (MXU, f32 accumulation).
    acc = lax.dot_general(
        x_ref[...],
        w_ref[...],
        dimension_numbers=(((1,), (1,)), ((), ())),
        preferred_element_type=jnp.float32,
    )
    # Bias add in f32 (VPU filler under the MXU/store path), then cast once.
    o_ref[...] = (acc + b_ref[...]).astype(o_ref.dtype)


def prepare_linear_probe_params(weight, bias, lane=_LANE):
    """One-time padding of the params to a lane-dense class dimension.

    weight: [C, D] (PyTorch nn.Linear layout), bias: [C].
    Returns (w_pad [C_pad, D], b_pad [1, C_pad]).  Do this at parameter-init /
    update time, NOT per forward call, so no extra weight copy is materialized
    on the hot path.
    """
    C, _ = weight.shape
    c_pad = ((C + lane - 1) // lane) * lane
    w_pad = jnp.pad(weight, ((0, c_pad - C), (0, 0)))
    b_pad = jnp.pad(bias, (0, c_pad - C)).reshape(1, c_pad)
    return w_pad, b_pad


@functools.partial(jax.jit, static_argnames=("num_classes", "block_b"))
def linear_probe_forward(x, w_pad, b_pad, *, num_classes, block_b=512):
    """x: [B, D]; w_pad: [C_pad, D]; b_pad: [1, C_pad]. Returns [B, num_classes]."""
    B, D = x.shape
    C_pad = w_pad.shape[0]

    # Batch tile: as large as reasonable for pipelining, rounded to the sublane
    # width, never larger than the (rounded-up) batch itself.
    # (block_b=512 keeps 2 double-buffered f32 (TB, D)+(TB, C_pad) tiles plus the
    #  resident weight comfortably under the scoped-VMEM default on v5e/v6e/v7x
    #  for D up to a few thousand.)
    tb = min(block_b, ((B + _SUBLANE - 1) // _SUBLANE) * _SUBLANE)
    b_rounded = ((B + tb - 1) // tb) * tb
    if b_rounded != B:
        x = jnp.pad(x, ((0, b_rounded - B), (0, 0)))

    grid = (b_rounded // tb,)

    out = pl.pallas_call(
        _linear_probe_kernel,
        out_shape=jax.ShapeDtypeStruct((b_rounded, C_pad), x.dtype),
        grid_spec=pltpu.PrefetchScalarGridSpec(
            num_scalar_prefetch=0,
            grid=grid,
            in_specs=[
                # x: tiled over batch -> BlockSpec double-buffers / pipelines the DMA.
                pl.BlockSpec((tb, D), lambda i: (i, 0)),
                # weight / bias: loop-invariant whole-array blocks, stay resident.
                pl.BlockSpec((C_pad, D), lambda i: (0, 0)),
                pl.BlockSpec((1, C_pad), lambda i: (0, 0)),
            ],
            out_specs=pl.BlockSpec((tb, C_pad), lambda i: (i, 0)),
        ),
        compiler_params=pltpu.CompilerParams(
            # Batch tiles are independent -> shard across TensorCores on v7x.
            dimension_semantics=("parallel",),
        ),
    )(x, w_pad, b_pad)

    # Strip batch and class padding (cheap slice, fused by XLA).
    return out[:B, :num_classes]

    # TODO(synk): if D ever grows past what fits as a single K block, add a trailing
    # "arbitrary" K grid axis with a f32 VMEM scratch accumulator (init at k==0,
    # bias-add/store at k==last).


if __name__ == "__main__":
    # Small shapes consistent with the module: LinearProbe(out_dim=32, num_classes=16)
    B, out_dim, num_classes = 8, 32, 16

    key = jax.random.PRNGKey(0)
    kx, kw, kb = jax.random.split(key, 3)

    # Deterministic parameter init mimicking torch.nn.Linear default
    # (uniform in [-1/sqrt(in_features), 1/sqrt(in_features)]).
    bound = 1.0 / (out_dim ** 0.5)
    weight = jax.random.uniform(kw, (num_classes, out_dim), jnp.float32,
                                minval=-bound, maxval=bound)
    bias = jax.random.uniform(kb, (num_classes,), jnp.float32,
                              minval=-bound, maxval=bound)
    x = jax.random.normal(kx, (B, out_dim), jnp.float32)

    # One-time parameter prep (lane-dense padding), outside the hot forward.
    w_pad, b_pad = prepare_linear_probe_params(weight, bias)

    out = linear_probe_forward(x, w_pad, b_pad, num_classes=num_classes)
    out = jax.block_until_ready(out)

    # Sanity check against plain-JAX reference of the PyTorch forward.
    ref = x @ weight.T + bias
    assert out.shape == (B, num_classes), out.shape
    assert jnp.allclose(out, ref, atol=1e-5, rtol=1e-5), float(jnp.abs(out - ref).max())

    print("KERNEL_OK")
</pallas_src>

<mosaic_0001>
module attributes {stable_mosaic.version = 11 : i64} {
  func.func @_linear_probe_kernel(%arg0: i32, %arg1: memref<8x32xf32, #tpu.memory_space<vmem>>, %arg2: memref<128x32xf32, #tpu.memory_space<vmem>>, %arg3: memref<1x128xf32, #tpu.memory_space<vmem>>, %arg4: memref<8x128xf32, #tpu.memory_space<vmem>>) attributes {dimension_semantics = [#tpu.dimension_semantics<parallel>], iteration_bounds = array<i64: 1>, scalar_prefetch = 0 : i64, scratch_operands = 0 : i64, tpu.core_type = #tpu.core_type<tc>, window_params = [{transform_indices = @transform_0, window_bounds = array<i64: 8, 32>}, {pipeline_mode = #tpu.pipeline_mode<synchronous>, transform_indices = @transform_1, window_bounds = array<i64: 128, 32>}, {pipeline_mode = #tpu.pipeline_mode<synchronous>, transform_indices = @transform_2, window_bounds = array<i64: 1, 128>}, {transform_indices = @transform_3, window_bounds = array<i64: 8, 128>}]} {
    %c0 = arith.constant 0 : index
    %c0_0 = arith.constant 0 : index
    %0 = vector.load %arg1[%c0, %c0_0] : memref<8x32xf32, #tpu.memory_space<vmem>>, vector<8x32xf32>
    %c0_1 = arith.constant 0 : index
    %c0_2 = arith.constant 0 : index
    %1 = vector.load %arg2[%c0_1, %c0_2] : memref<128x32xf32, #tpu.memory_space<vmem>>, vector<128x32xf32>
    %cst = arith.constant dense<0.000000e+00> : vector<8x128xf32>
    %2 = tpu.matmul %0, %1, %cst {dimension_numbers = #tpu.dot_dimension_numbers<[1], [1], [0], [0], [0, 0, 1, 0], [], []>} : vector<8x32xf32>, vector<128x32xf32>, vector<8x128xf32> -> vector<8x128xf32>
    %c0_3 = arith.constant 0 : index
    %c0_4 = arith.constant 0 : index
    %3 = vector.load %arg3[%c0_3, %c0_4] : memref<1x128xf32, #tpu.memory_space<vmem>>, vector<1x128xf32>
    %4 = vector.broadcast %3 : vector<1x128xf32> to vector<8x128xf32>
    %5 = arith.addf %2, %4 : vector<8x128xf32>
    %c0_5 = arith.constant 0 : index
    %c0_6 = arith.constant 0 : index
    %6 = vector.load %arg4[%c0_5, %c0_6] : memref<8x128xf32, #tpu.memory_space<vmem>>, vector<8x128xf32>
    tpu.vector_store %arg4[%c0_5, %c0_6], %5 {strides = array<i32>} : memref<8x128xf32, #tpu.memory_space<vmem>>, vector<8x128xf32>,
    return
  }
  func.func @transform_0(%arg0: i32) -> (i32, i32) {
    %c0_i32 = arith.constant 0 : i32
    %c0_i32_0 = arith.constant 0 : i32
    return %arg0, %c0_i32 : i32, i32
  }
  func.func @transform_1(%arg0: i32) -> (i32, i32) {
    %c0_i32 = arith.constant 0 : i32
    %c0_i32_0 = arith.constant 0 : i32
    %c0_i32_1 = arith.constant 0 : i32
    return %c0_i32, %c0_i32_0 : i32, i32
  }
  func.func @transform_2(%arg0: i32) -> (i32, i32) {
    %c0_i32 = arith.constant 0 : i32
    %c0_i32_0 = arith.constant 0 : i32
    %c0_i32_1 = arith.constant 0 : i32
    return %c0_i32, %c0_i32_0 : i32, i32
  }
  func.func @transform_3(%arg0: i32) -> (i32, i32) {
    %c0_i32 = arith.constant 0 : i32
    %c0_i32_0 = arith.constant 0 : i32
    return %arg0, %c0_i32 : i32, i32
  }
}

</mosaic_0001>

<bundles_post_ra>
// kernel: linear_probe_forward.1
= control target key start
LH: loop header
LB: loop body
LE: loop exit
PB: predicated region body
PF: predicated region fallthrough
CT: control target
= control target key end

     0   :  { %vm36_vm0 = vcmask 261120   ;;  %s265_s0 = inlined_call_operand.vmem [shape: f32[8,32], index: 0, kind: input, shape index: {}]   ;;  %s266_s1 = inlined_call_operand.vmem [shape: f32[128,32], index: 1, kind: input, shape index: {}]   ;;  %s267_s2 = inlined_call_operand.vmem [shape: f32[1,128], index: 2, kind: input, shape index: {}]   ;;  %s268_s3 = inlined_call_operand.hbm [shape: f32[8,128], index: 3, kind: output, shape index: {}]  }
   0x1   :  { %v31_v0 = vld [vmem:[%s266_s1 + $0x78] sm:$0xff]  ;;  %v30_v1 = vld [vmem:[%s266_s1 + $0x70] sm:$0xff] }
   0x2   :  { %125 = vmatpush.xpose.msk.msra.mxu0 %vm36_vm0, %v31_v0 }
   0x3   :  { %8 = vsyncpa [#allocation3], 0  ;;  %v29_v2 = vld [vmem:[%s266_s1 + $0x68] sm:$0xff]  ;;  %v28_v3 = vld [vmem:[%s266_s1 + $0x60] sm:$0xff]  ;;  %s170_s21 = smov [#allocation2]   ;;  %s116_s25 = sshll.u32 %s268_s3, 4  ;;  %s117_s25 = int_to_ptr.hbm [resolvable:$true] %s116_s25 }
   0x4   :  { %v27_v4 = vld [vmem:[%s266_s1 + $0x58] sm:$0xff]  ;;  %v26_v5 = vld [vmem:[%s266_s1 + $0x50] sm:$0xff]  ;;  %v25_v6 = vld [vmem:[%s266_s1 + $0x48] sm:$0xff]  ;;  %s114_s22 = sshll.u32 %s170_s21, 4  ;;  %s115_s22 = int_to_ptr.vmem [resolvable:$true] %s114_s22 }
   0x5   :  { %v24_v7 = vld [vmem:[%s266_s1 + $0x40] sm:$0xff]  ;;  %v23_v8 = vld [vmem:[%s266_s1 + $0x38] sm:$0xff]  ;;  %v22_v9 = vld [vmem:[%s266_s1 + $0x30] sm:$0xff] }
   0x6   :  { %126 = vmatpush.xpose.msk.msra.mxu0 %vm36_vm0, %v30_v1  ;;  %v21_v10 = vld [vmem:[%s266_s1 + $0x28] sm:$0xff]  ;;  %v20_v11 = vld [vmem:[%s266_s1 + $0x20] sm:$0xff]  ;;  %v19_v12 = vld [vmem:[%s266_s1 + $0x18] sm:$0xff] }
   0x7   :  { %v18_v13 = vld [vmem:[%s266_s1 + $0x10] sm:$0xff]  ;;  %v17_v14 = vld [vmem:[%s266_s1 + $0x8] sm:$0xff]  ;;  %v16_v15 = vld [vmem:[%s266_s1] sm:$0xff] }
   0x8   :  { %v15_v16 = vld [vmem:[%s265_s0] sm:$0xff] }
   0x9   :  { %v143_v17 = vld [vmem:[%s267_s2] ss:$0 sm:$0xff] }
   0xa   :  { %127 = vmatpush.xpose.msk.msra.mxu0 %vm36_vm0, %v29_v2 }
   0xe   :  { %128 = vmatpush.xpose.msk.msra.mxu0 %vm36_vm0, %v28_v3 }
  0x12   :  { %129 = vmatpush.xpose.msk.msra.mxu0 %vm36_vm0, %v27_v4 }
  0x16   :  { %130 = vmatpush.xpose.msk.msra.mxu0 %vm36_vm0, %v26_v5 }
  0x1a   :  { %131 = vmatpush.xpose.msk.msra.mxu0 %vm36_vm0, %v25_v6 }
  0x1e   :  { %132 = vmatpush.xpose.msk.msra.mxu0 %vm36_vm0, %v24_v7 }
  0x22   :  { %133 = vmatpush.xpose.msk.msra.mxu0 %vm36_vm0, %v23_v8 }
  0x26   :  { %134 = vmatpush.xpose.msk.msra.mxu0 %vm36_vm0, %v22_v9 }
  0x2a   :  { %135 = vmatpush.xpose.msk.msra.mxu0 %vm36_vm0, %v21_v10 }
  0x2e   :  { %136 = vmatpush.xpose.msk.msra.mxu0 %vm36_vm0, %v20_v11 }
  0x32   :  { %137 = vmatpush.xpose.msk.msra.mxu0 %vm36_vm0, %v19_v12 }
  0x36   :  { %138 = vmatpush.xpose.msk.msra.mxu0 %vm36_vm0, %v18_v13 }
  0x3a   :  { %139 = vmatpush.xpose.msk.msra.mxu0 %vm36_vm0, %v17_v14 }
  0x3e   :  { %140 = vmatpush.xpose.msk.msra.mxu0 %vm36_vm0, %v16_v15 }
  0x41   :  { %141 = vmatmul.msk.f32.vlgmr.msra.gmra.mxu0 %vm36_vm0, %v15_v16 }
  0xbe   :  { %v105_v18 = vpop.f32.mrf.mxu0 }
  0xbf   :  { %v106_v19 = vadd.f32 %v143_v17, %v105_v18 }
  0xc1   :  { %108 = vst [vmem:[#allocation2] sm:$0xff] %v106_v19 }
  0xc2   :  { %119 = dma.vmem_to_hbm [thread:$0]  %s115_s22, 128, %s117_s25, [#allocation3]  }
  0xc3   :  { %168 = dma.done.wait [#allocation3], 128  }
  0xc4   :  { %169 = vsyncadd [#allocation3], 4294967168 }
  0xc5   :  { %124 = vsyncpa [#allocation3], 1 }

</bundles_post_ra>
